<compile_context>
chip_gen: v6e
topology: v6e:2x2x1
jax: 0.10.0
libtpu: 0.0.40
codegen_flags: <defaults>
</compile_context>

<pallas_src>
import jax
import jax.numpy as jnp
from jax.experimental import pallas as pl
from jax.experimental.pallas import tpu as pltpu


def actor_kernel(x_ref, w1_ref, b1_ref, w2_ref, b2_ref,
                 w3_ref, b3_ref, w4_ref, b4_ref, out_ref):
    # Layers 1-3: bf16 into the MXU, f32 accumulate, f32 VPU bias/ReLU.
    h = jnp.dot(x_ref[...], w1_ref[...], preferred_element_type=jnp.float32)
    h = jnp.maximum(h + b1_ref[...], 0.0)
    h = jnp.dot(h.astype(jnp.bfloat16), w2_ref[...],
                preferred_element_type=jnp.float32)
    h = jnp.maximum(h + b2_ref[...], 0.0)
    h = jnp.dot(h.astype(jnp.bfloat16), w3_ref[...],
                preferred_element_type=jnp.float32)
    h = jnp.maximum(h + b3_ref[...], 0.0)
    # Output layer kept in f32 (tiny 128 x n_actions dot, tighter parity).
    logits = jnp.dot(h, w4_ref[...], preferred_element_type=jnp.float32)
    logits = logits + b4_ref[...]
    # Numerically-stable softmax with EXACT division (one divide per row).
    m = jnp.max(logits, axis=-1, keepdims=True)
    e = jnp.exp(logits - m)
    out_ref[...] = (e / jnp.sum(e, axis=-1, keepdims=True)).astype(out_ref.dtype)


def _round_up(n, m):
    return (n + m - 1) // m * m


def prepare_params(params):
    """One-time weight prep (per optimizer update, NOT per forward call):
    bf16 hidden-layer weights for the MXU, f32 biases as (1, out) rows,
    final layer kept f32.  Hoisted out of the hot path so the per-step (B=8)
    forward does not pay 4 cast kernels + reshapes every call."""
    def row(b):
        return jnp.asarray(b, jnp.float32).reshape(1, -1)
    return dict(
        w1=jnp.asarray(params["w1"], jnp.bfloat16),
        w2=jnp.asarray(params["w2"], jnp.bfloat16),
        w3=jnp.asarray(params["w3"], jnp.bfloat16),
        w4=jnp.asarray(params["w4"], jnp.float32),
        b1=row(params["b1"]), b2=row(params["b2"]),
        b3=row(params["b3"]), b4=row(params["b4"]),
    )


def actor_forward(x, prep, *, batch_tile=None):
    """x: (B, input_dim) float32.  prep: output of prepare_params()."""
    B, in_dim = x.shape
    n_actions = prep["w4"].shape[1]

    if batch_tile is None:
        # >=128 rows to fill the MXU's M; cap at 2048 rows (per-grid-step
        # overhead ~0.35us dominates below that, VMEM use stays ~few MiB);
        # for large batches split into >=2 grid steps so both v7x TensorCores
        # get work via the "parallel" batch axis.
        batch_tile = max(128, min(2048, _round_up(-(-B // 2), 128)))
    assert batch_tile % 8 == 0, "batch_tile must be a multiple of 8 (sublanes)"

    B_pad = _round_up(B, batch_tile)
    # Pad batch with zero rows (sliced off after the call); feed bf16 to MXU.
    x_p = x if B_pad == B else jnp.pad(x, ((0, B_pad - B), (0, 0)))
    x_p = x_p.astype(jnp.bfloat16)

    def bx(i):          # batch-tiled arrays
        return (i, 0)

    def bw(i):          # weights/biases: same block every step -> resident
        return (0, 0)

    in_specs = [
        pl.BlockSpec((batch_tile, in_dim), bx),                           # x
        pl.BlockSpec(prep["w1"].shape, bw), pl.BlockSpec(prep["b1"].shape, bw),
        pl.BlockSpec(prep["w2"].shape, bw), pl.BlockSpec(prep["b2"].shape, bw),
        pl.BlockSpec(prep["w3"].shape, bw), pl.BlockSpec(prep["b3"].shape, bw),
        pl.BlockSpec(prep["w4"].shape, bw), pl.BlockSpec(prep["b4"].shape, bw),
    ]
    out_spec = pl.BlockSpec((batch_tile, n_actions), bx)

    out = pl.pallas_call(
        actor_kernel,
        out_shape=jax.ShapeDtypeStruct((B_pad, n_actions), jnp.float32),
        grid_spec=pltpu.PrefetchScalarGridSpec(
            num_scalar_prefetch=0,
            grid=(B_pad // batch_tile,),
            in_specs=in_specs,
            out_specs=out_spec,
        ),
        compiler_params=pltpu.CompilerParams(
            dimension_semantics=("parallel",),      # batch axis -> v7x megacore
            vmem_limit_bytes=32 * 1024 * 1024,
        ),
    )(x_p, prep["w1"], prep["b1"], prep["w2"], prep["b2"],
      prep["w3"], prep["b3"], prep["w4"], prep["b4"])

    # TODO(synk): for the PPO per-env-step path (B=8) dispatch + the ~100 KB
    # weight DMA dominates; amortize by batching env steps per call or keeping
    # weights resident across calls (cross-pallas_call VMEM/semaphore futures).
    return out[:B] if B_pad != B else out


def init_params(key, input_dim, n_actions, hidden_dim=128):
    """Deterministic synthetic init (uniform, PyTorch-Linear-like scale)."""
    keys = jax.random.split(key, 8)

    def lin(kw, kb, fan_in, fan_out):
        bound = 1.0 / jnp.sqrt(float(fan_in))
        w = jax.random.uniform(kw, (fan_in, fan_out), jnp.float32, -bound, bound)
        b = jax.random.uniform(kb, (1, fan_out), jnp.float32, -bound, bound)
        return w, b

    w1, b1 = lin(keys[0], keys[1], input_dim, hidden_dim)
    w2, b2 = lin(keys[2], keys[3], hidden_dim, hidden_dim)
    w3, b3 = lin(keys[4], keys[5], hidden_dim, hidden_dim)
    w4, b4 = lin(keys[6], keys[7], hidden_dim, n_actions)
    return dict(w1=w1, b1=b1, w2=w2, b2=b2, w3=w3, b3=b3, w4=w4, b4=b4)


def actor_ref_f32(x, p):
    """Pure-JAX full-f32 reference (matches the PyTorch forward)."""
    h = jax.nn.relu(x @ p["w1"] + p["b1"])
    h = jax.nn.relu(h @ p["w2"] + p["b2"])
    h = jax.nn.relu(h @ p["w3"] + p["b3"])
    logits = h @ p["w4"] + p["b4"]
    return jax.nn.softmax(logits, axis=-1)


def actor_ref_matched(x, p):
    """Pure-JAX reference with the kernel's precision scheme:
    bf16-in / f32-accumulate dots for layers 1-3, f32 final layer."""
    bf = jnp.bfloat16

    def dot_bf(a, w):
        return jnp.dot(a.astype(bf), jnp.asarray(w, bf),
                       preferred_element_type=jnp.float32)

    h = jax.nn.relu(dot_bf(x, p["w1"]) + p["b1"])
    h = jax.nn.relu(dot_bf(h, p["w2"]) + p["b2"])
    h = jax.nn.relu(dot_bf(h, p["w3"]) + p["b3"])
    logits = h @ p["w4"] + p["b4"]
    return jax.nn.softmax(logits, axis=-1)


if __name__ == "__main__":
    # LunarLander-v2: observation dim = 8, n_actions = 4.
    INPUT_DIM, N_ACTIONS, HIDDEN = 8, 4, 128

    key = jax.random.PRNGKey(0)
    kx1, kx2, kp = jax.random.split(key, 3)
    params = init_params(kp, INPUT_DIM, N_ACTIONS, HIDDEN)

    # One-time weight prep (per optimizer update), outside the hot path.
    prep = jax.block_until_ready(prepare_params(params))

    fwd = jax.jit(actor_forward)

    # Case 1: PPO per-env-step batch (B=8) -> padded to a single 128-row tile.
    x_small = jax.random.normal(kx1, (8, INPUT_DIM), dtype=jnp.float32)
    out_small = jax.block_until_ready(fwd(x_small, prep))

    # Case 2: rollout/eval batch (B=1024) -> two 512-row tiles (pipelined,
    # and split across the two TensorCores on v7x).
    x_big = jax.random.normal(kx2, (1024, INPUT_DIM), dtype=jnp.float32)
    out_big = jax.block_until_ready(fwd(x_big, prep))

    for x, out in ((x_small, out_small), (x_big, out_big)):
        assert out.shape == (x.shape[0], N_ACTIONS)
        assert bool(jnp.all(out >= 0.0))
        # Exact softmax divide -> rows sum to 1 within f32 rounding.
        assert jnp.allclose(jnp.sum(out, axis=-1), 1.0, atol=1e-3)
        # Matches a precision-matched (bf16-dot) reference tightly ...
        assert jnp.allclose(out, actor_ref_matched(x, params), atol=5e-3)
        # ... and the full-f32 reference within bf16 rounding slack.
        assert jnp.allclose(out, actor_ref_f32(x, params), atol=3e-2, rtol=3e-2)

    print("KERNEL_OK")
</pallas_src>

<mosaic_0001>
module attributes {stable_mosaic.version = 11 : i64} {
  func.func @actor_kernel(%arg0: i32, %arg1: memref<128x8xbf16, #tpu.memory_space<vmem>>, %arg2: memref<8x128xbf16, #tpu.memory_space<vmem>>, %arg3: memref<1x128xf32, #tpu.memory_space<vmem>>, %arg4: memref<128x128xbf16, #tpu.memory_space<vmem>>, %arg5: memref<1x128xf32, #tpu.memory_space<vmem>>, %arg6: memref<128x128xbf16, #tpu.memory_space<vmem>>, %arg7: memref<1x128xf32, #tpu.memory_space<vmem>>, %arg8: memref<128x4xf32, #tpu.memory_space<vmem>>, %arg9: memref<1x4xf32, #tpu.memory_space<vmem>>, %arg10: memref<128x4xf32, #tpu.memory_space<vmem>>) attributes {dimension_semantics = [#tpu.dimension_semantics<parallel>], iteration_bounds = array<i64: 1>, scalar_prefetch = 0 : i64, scratch_operands = 0 : i64, tpu.core_type = #tpu.core_type<tc>, window_params = [{transform_indices = @transform_0, window_bounds = array<i64: 128, 8>}, {pipeline_mode = #tpu.pipeline_mode<synchronous>, transform_indices = @transform_1, window_bounds = array<i64: 8, 128>}, {pipeline_mode = #tpu.pipeline_mode<synchronous>, transform_indices = @transform_2, window_bounds = array<i64: 1, 128>}, {pipeline_mode = #tpu.pipeline_mode<synchronous>, transform_indices = @transform_3, window_bounds = array<i64: 128, 128>}, {pipeline_mode = #tpu.pipeline_mode<synchronous>, transform_indices = @transform_4, window_bounds = array<i64: 1, 128>}, {pipeline_mode = #tpu.pipeline_mode<synchronous>, transform_indices = @transform_5, window_bounds = array<i64: 128, 128>}, {pipeline_mode = #tpu.pipeline_mode<synchronous>, transform_indices = @transform_6, window_bounds = array<i64: 1, 128>}, {pipeline_mode = #tpu.pipeline_mode<synchronous>, transform_indices = @transform_7, window_bounds = array<i64: 128, 4>}, {pipeline_mode = #tpu.pipeline_mode<synchronous>, transform_indices = @transform_8, window_bounds = array<i64: 1, 4>}, {transform_indices = @transform_9, window_bounds = array<i64: 128, 4>}]} {
    %c0 = arith.constant 0 : index
    %c0_0 = arith.constant 0 : index
    %0 = vector.load %arg1[%c0, %c0_0] : memref<128x8xbf16, #tpu.memory_space<vmem>>, vector<128x8xbf16>
    %c0_1 = arith.constant 0 : index
    %c0_2 = arith.constant 0 : index
    %1 = vector.load %arg2[%c0_1, %c0_2] : memref<8x128xbf16, #tpu.memory_space<vmem>>, vector<8x128xbf16>
    %cst = arith.constant dense<0.000000e+00> : vector<128x128xf32>
    %2 = tpu.matmul %0, %1, %cst {dimension_numbers = #tpu.dot_dimension_numbers<[1], [0], [0], [1], [0, 0, 1, 1], [], []>} : vector<128x8xbf16>, vector<8x128xbf16>, vector<128x128xf32> -> vector<128x128xf32>
    %c0_3 = arith.constant 0 : index
    %c0_4 = arith.constant 0 : index
    %3 = vector.load %arg3[%c0_3, %c0_4] : memref<1x128xf32, #tpu.memory_space<vmem>>, vector<1x128xf32>
    %4 = vector.broadcast %3 : vector<1x128xf32> to vector<128x128xf32>
    %5 = arith.addf %2, %4 : vector<128x128xf32>
    %cst_5 = arith.constant 0.000000e+00 : f32
    %6 = vector.broadcast %cst_5 : f32 to vector<128x128xf32>
    %7 = arith.maximumf %5, %6 : vector<128x128xf32>
    %8 = arith.truncf %7 : vector<128x128xf32> to vector<128x128xbf16>
    %c0_6 = arith.constant 0 : index
    %c0_7 = arith.constant 0 : index
    %9 = vector.load %arg4[%c0_6, %c0_7] : memref<128x128xbf16, #tpu.memory_space<vmem>>, vector<128x128xbf16>
    %cst_8 = arith.constant dense<0.000000e+00> : vector<128x128xf32>
    %10 = tpu.matmul %8, %9, %cst_8 {dimension_numbers = #tpu.dot_dimension_numbers<[1], [0], [0], [1], [0, 0, 1, 1], [], []>} : vector<128x128xbf16>, vector<128x128xbf16>, vector<128x128xf32> -> vector<128x128xf32>
    %c0_9 = arith.constant 0 : index
    %c0_10 = arith.constant 0 : index
    %11 = vector.load %arg5[%c0_9, %c0_10] : memref<1x128xf32, #tpu.memory_space<vmem>>, vector<1x128xf32>
    %12 = vector.broadcast %11 : vector<1x128xf32> to vector<128x128xf32>
    %13 = arith.addf %10, %12 : vector<128x128xf32>
    %cst_11 = arith.constant 0.000000e+00 : f32
    %14 = vector.broadcast %cst_11 : f32 to vector<128x128xf32>
    %15 = arith.maximumf %13, %14 : vector<128x128xf32>
    %16 = arith.truncf %15 : vector<128x128xf32> to vector<128x128xbf16>
    %c0_12 = arith.constant 0 : index
    %c0_13 = arith.constant 0 : index
    %17 = vector.load %arg6[%c0_12, %c0_13] : memref<128x128xbf16, #tpu.memory_space<vmem>>, vector<128x128xbf16>
    %cst_14 = arith.constant dense<0.000000e+00> : vector<128x128xf32>
    %18 = tpu.matmul %16, %17, %cst_14 {dimension_numbers = #tpu.dot_dimension_numbers<[1], [0], [0], [1], [0, 0, 1, 1], [], []>} : vector<128x128xbf16>, vector<128x128xbf16>, vector<128x128xf32> -> vector<128x128xf32>
    %c0_15 = arith.constant 0 : index
    %c0_16 = arith.constant 0 : index
    %19 = vector.load %arg7[%c0_15, %c0_16] : memref<1x128xf32, #tpu.memory_space<vmem>>, vector<1x128xf32>
    %20 = vector.broadcast %19 : vector<1x128xf32> to vector<128x128xf32>
    %21 = arith.addf %18, %20 : vector<128x128xf32>
    %cst_17 = arith.constant 0.000000e+00 : f32
    %22 = vector.broadcast %cst_17 : f32 to vector<128x128xf32>
    %23 = arith.maximumf %21, %22 : vector<128x128xf32>
    %c0_18 = arith.constant 0 : index
    %c0_19 = arith.constant 0 : index
    %24 = vector.load %arg8[%c0_18, %c0_19] : memref<128x4xf32, #tpu.memory_space<vmem>>, vector<128x4xf32>
    %cst_20 = arith.constant dense<0.000000e+00> : vector<128x4xf32>
    %25 = tpu.matmul %23, %24, %cst_20 {dimension_numbers = #tpu.dot_dimension_numbers<[1], [0], [0], [1], [0, 0, 1, 1], [], []>} : vector<128x128xf32>, vector<128x4xf32>, vector<128x4xf32> -> vector<128x4xf32>
    %c0_21 = arith.constant 0 : index
    %c0_22 = arith.constant 0 : index
    %26 = vector.load %arg9[%c0_21, %c0_22] : memref<1x4xf32, #tpu.memory_space<vmem>>, vector<1x4xf32>
    %27 = vector.broadcast %26 : vector<1x4xf32> to vector<128x4xf32>
    %28 = arith.addf %25, %27 : vector<128x4xf32>
    %cst_23 = arith.constant dense<0xFF800000> : vector<128xf32>
    %29 = vector.multi_reduction <maximumf>, %28, %cst_23 [1] : vector<128x4xf32> to vector<128xf32>
    %30 = vector.shape_cast %29 : vector<128xf32> to vector<128x1xf32>
    %31 = vector.broadcast %30 : vector<128x1xf32> to vector<128x4xf32>
    %32 = arith.subf %28, %31 : vector<128x4xf32>
    %33 = math.exp %32 : vector<128x4xf32>
    %cst_24 = arith.constant dense<0.000000e+00> : vector<128xf32>
    %34 = vector.multi_reduction <add>, %33, %cst_24 [1] : vector<128x4xf32> to vector<128xf32>
    %35 = vector.shape_cast %34 : vector<128xf32> to vector<128x1xf32>
    %36 = vector.broadcast %35 : vector<128x1xf32> to vector<128x4xf32>
    %37 = arith.divf %33, %36 : vector<128x4xf32>
    %c0_25 = arith.constant 0 : index
    %c0_26 = arith.constant 0 : index
    %38 = vector.load %arg10[%c0_25, %c0_26] : memref<128x4xf32, #tpu.memory_space<vmem>>, vector<128x4xf32>
    tpu.vector_store %arg10[%c0_25, %c0_26], %37 {strides = array<i32>} : memref<128x4xf32, #tpu.memory_space<vmem>>, vector<128x4xf32>,
    return
  }
  func.func @transform_0(%arg0: i32) -> (i32, i32) {
    %c0_i32 = arith.constant 0 : i32
    %c0_i32_0 = arith.constant 0 : i32
    return %arg0, %c0_i32 : i32, i32
  }
  func.func @transform_1(%arg0: i32) -> (i32, i32) {
    %c0_i32 = arith.constant 0 : i32
    %c0_i32_0 = arith.constant 0 : i32
    %c0_i32_1 = arith.constant 0 : i32
    return %c0_i32, %c0_i32_0 : i32, i32
  }
  func.func @transform_2(%arg0: i32) -> (i32, i32) {
    %c0_i32 = arith.constant 0 : i32
    %c0_i32_0 = arith.constant 0 : i32
    %c0_i32_1 = arith.constant 0 : i32
    return %c0_i32, %c0_i32_0 : i32, i32
  }
  func.func @transform_3(%arg0: i32) -> (i32, i32) {
    %c0_i32 = arith.constant 0 : i32
    %c0_i32_0 = arith.constant 0 : i32
    %c0_i32_1 = arith.constant 0 : i32
    return %c0_i32, %c0_i32_0 : i32, i32
  }
  func.func @transform_4(%arg0: i32) -> (i32, i32) {
    %c0_i32 = arith.constant 0 : i32
    %c0_i32_0 = arith.constant 0 : i32
    %c0_i32_1 = arith.constant 0 : i32
    return %c0_i32, %c0_i32_0 : i32, i32
  }
  func.func @transform_5(%arg0: i32) -> (i32, i32) {
    %c0_i32 = arith.constant 0 : i32
    %c0_i32_0 = arith.constant 0 : i32
    %c0_i32_1 = arith.constant 0 : i32
    return %c0_i32, %c0_i32_0 : i32, i32
  }
  func.func @transform_6(%arg0: i32) -> (i32, i32) {
    %c0_i32 = arith.constant 0 : i32
    %c0_i32_0 = arith.constant 0 : i32
    %c0_i32_1 = arith.constant 0 : i32
    return %c0_i32, %c0_i32_0 : i32, i32
  }
  func.func @transform_7(%arg0: i32) -> (i32, i32) {
    %c0_i32 = arith.constant 0 : i32
    %c0_i32_0 = arith.constant 0 : i32
    %c0_i32_1 = arith.constant 0 : i32
    return %c0_i32, %c0_i32_0 : i32, i32
  }
  func.func @transform_8(%arg0: i32) -> (i32, i32) {
    %c0_i32 = arith.constant 0 : i32
    %c0_i32_0 = arith.constant 0 : i32
    %c0_i32_1 = arith.constant 0 : i32
    return %c0_i32, %c0_i32_0 : i32, i32
  }
  func.func @transform_9(%arg0: i32) -> (i32, i32) {
    %c0_i32 = arith.constant 0 : i32
    %c0_i32_0 = arith.constant 0 : i32
    return %arg0, %c0_i32 : i32, i32
  }
}

</mosaic_0001>

<bundles_post_ra>
// kernel: actor_forward.1
= control target key start
LH: loop header
LB: loop body
LE: loop exit
PB: predicated region body
PF: predicated region fallthrough
CT: control target
= control target key end

     0   :  { %vm122_vm0 = vcmask 1043456   ;;  %vm97_vm1 = vcmask 64512   ;;  %vm791_vm2 = vcmask 31744   ;;  %s1845_s1 = inlined_call_operand.vmem [shape: bf16[8,128], index: 1, kind: input, shape index: {}]   ;;  %s1846_s0 = inlined_call_operand.vmem [shape: bf16[128,8], index: 0, kind: input, shape index: {}]   ;;  %s1847_s3 = inlined_call_operand.vmem [shape: bf16[128,128], index: 3, kind: input, shape index: {}]   ;;  %s1848_s5 = inlined_call_operand.vmem [shape: bf16[128,128], index: 5, kind: input, shape index: {}]   ;;  %s1849_s2 = inlined_call_operand.vmem [shape: f32[1,128], index: 2, kind: input, shape index: {}]   ;;  %s1850_s7 = inlined_call_operand.vmem [shape: f32[128,4], index: 7, kind: input, shape index: {}]   ;;  %s1851_s4 = inlined_call_operand.vmem [shape: f32[1,128], index: 4, kind: input, shape index: {}]   ;;  %s1852_s6 = inlined_call_operand.vmem [shape: f32[1,128], index: 6, kind: input, shape index: {}]   ;;  %s1853_s8 = inlined_call_operand.vmem [shape: f32[1,4], index: 8, kind: input, shape index: {}]   ;;  %s1854_s9 = inlined_call_operand.vmem [shape: f32[128,4], index: 9, kind: output, shape index: {}]  }
   0x1   :  { %v49_v0 = vld [vmem:[%s1845_s1] sm:$0xf]  ;;  %v1269_v3 = vld [vmem:[%s1846_s0 + $0x8] sm:$0xff]   ;;  %v1270_v4 = vld [vmem:[%s1846_s0 + $0x10] sm:$0xff]  }
   0x2   :  { %1267 = vmatprep.subr.msk.bf16.mxu0 %vm122_vm0, %v49_v0  ;;  %v124_v1 = vsel %vm122_vm0, %v49_v0, 0  ;;  %v1268_v2 = vld [vmem:[%s1846_s0] sm:$0xff]   ;;  %v1271_v5 = vld [vmem:[%s1846_s0 + $0x18] sm:$0xff]   ;;  %v1277_v8 = vld [vmem:[%s1847_s3 + $0x30] sm:$0xff]  }
   0x3   :  { %1098 = vmatpush3.bf16.msra.mxu0 %v124_v1  ;;  %1099 = vmatprep.mubr.msk.bf16.mxu0 %vm97_vm1, %v1268_v2  ;;  %v1272_v6 = vld [vmem:[%s1846_s0 + $0x20] sm:$0xff]   ;;  %v1276_v7 = vld [vmem:[%s1847_s3 + $0x38] sm:$0xff]   ;;  %v1278_v9 = vld [vmem:[%s1847_s3 + $0x28] sm:$0xff]  }
   0x4   :  { %1115 = vmatprep.subr.bf16.mxu1 %v1276_v7  ;;  %v1273_v10 = vld [vmem:[%s1846_s0 + $0x28] sm:$0xff]   ;;  %v1279_v11 = vld [vmem:[%s1847_s3 + $0x20] sm:$0xff]   ;;  %v1274_v12 = vld [vmem:[%s1846_s0 + $0x30] sm:$0xff]  }
   0x5   :  { %1116 = vmatpush3.bf16.msra.mxu1 %v1276_v7  ;;  %v1280_v13 = vld [vmem:[%s1847_s3 + $0x18] sm:$0xff]   ;;  %v1281_v15 = vld [vmem:[%s1847_s3 + $0x10] sm:$0xff]   ;;  %v1282_v16 = vld [vmem:[%s1847_s3 + $0x8] sm:$0xff]  }
   0x6   :  { %1100 = vmatmul.mubr.msk.bf16.vlgmr.msra.gmra.mxu0 %vm97_vm1, %v1269_v3  ;;  %1117 = vmatprep.subr.bf16.mxu1 %v1277_v8  ;;  %v1275_v14 = vld [vmem:[%s1846_s0 + $0x38] sm:$0xff]   ;;  %v1283_v17 = vld [vmem:[%s1847_s3] sm:$0xff]   ;;  %v1285_v19 = vld [vmem:[%s1848_s5 + $0x30] sm:$0xff]  }
   0x7   :  { %1103 = vmatprep.mubr.msk.bf16.mxu0 %vm97_vm1, %v1270_v4  ;;  %v1284_v18 = vld [vmem:[%s1848_s5 + $0x38] sm:$0xff]   ;;  %v1286_v20 = vld [vmem:[%s1848_s5 + $0x28] sm:$0xff]   ;;  %v1287_v21 = vld [vmem:[%s1848_s5 + $0x20] sm:$0xff]  }
   0x8   :  { %1147 = vmatprep.subr.bf16.mxu0 %v1284_v18  ;;  %v1288_v22 = vld [vmem:[%s1848_s5 + $0x18] sm:$0xff]   ;;  %v988_v25 = vld [vmem:[%s1849_s2] ss:$0 sm:$0xff] }
   0x9   :  { %1118 = vmatpush3.bf16.msra.mxu1 %v1277_v8  ;;  %1148 = vmatpush3.bf16.msra.mxu0 %v1284_v18  ;;  %v1291_v18 = vld [vmem:[%s1848_s5] sm:$0xff]  }
   0xa   :  { %1119 = vmatprep.subr.bf16.mxu1 %v1278_v9  ;;  %1149 = vmatprep.subr.bf16.mxu0 %v1285_v19 }
   0xd   :  { %1120 = vmatpush3.bf16.msra.mxu1 %v1278_v9  ;;  %1150 = vmatpush3.bf16.msra.mxu0 %v1285_v19  ;;  %v638_v19 = vld [vmem:[%s1850_s7 + $0x78] sm:$0xff] }
   0xe   :  { %1104 = vmatmul.mubr.msk.bf16.gmra.mxu0 %vm97_vm1, %v1271_v5  ;;  %1121 = vmatprep.subr.bf16.mxu1 %v1279_v11 }
   0xf   :  { %1107 = vmatprep.mubr.msk.bf16.mxu0 %vm97_vm1, %v1272_v6  ;;  %1151 = vmatprep.subr.bf16.mxu0 %v1286_v20 }
  0x11   :  { %1122 = vmatpush3.bf16.msra.mxu1 %v1279_v11  ;;  %1152 = vmatpush3.bf16.msra.mxu0 %v1286_v20  ;;  %v637_v20 = vld [vmem:[%s1850_s7 + $0x70] sm:$0xff] }
  0x12   :  { %1123 = vmatprep.subr.bf16.mxu1 %v1280_v13  ;;  %1153 = vmatprep.subr.bf16.mxu0 %v1287_v21 }
  0x15   :  { %1124 = vmatpush3.bf16.msra.mxu1 %v1280_v13  ;;  %1154 = vmatpush3.bf16.msra.mxu0 %v1287_v21  ;;  %v1501_v21 = vld [vmem:[%s1850_s7 + $0x68] sm:$0xff] }
  0x16   :  { %1108 = vmatmul.mubr.msk.bf16.gmra.mxu0 %vm97_vm1, %v1273_v10  ;;  %1125 = vmatprep.subr.bf16.mxu1 %v1281_v15 }
  0x17   :  { %1111 = vmatprep.mubr.msk.bf16.mxu0 %vm97_vm1, %v1274_v12  ;;  %1155 = vmatprep.subr.bf16.mxu0 %v1288_v22 }
  0x19   :  { %1126 = vmatpush3.bf16.msra.mxu1 %v1281_v15  ;;  %1156 = vmatpush3.bf16.msra.mxu0 %v1288_v22  ;;  %v1507_v22 = vld [vmem:[%s1850_s7 + $0x60] sm:$0xff] }
  0x1a   :  { %1127 = vmatprep.subr.bf16.mxu1 %v1282_v16 }
  0x1d   :  { %1128 = vmatpush3.bf16.msra.mxu1 %v1282_v16  ;;  %v1289_v16 = vld [vmem:[%s1848_s5 + $0x10] sm:$0xff]  }
  0x1e   :  { %1112 = vmatmul.mubr.msk.bf16.gmra.mxu0 %vm97_vm1, %v1275_v14  ;;  %1129 = vmatprep.subr.bf16.mxu1 %v1283_v17 }
  0x1f   :  { %1157 = vmatprep.subr.bf16.mxu0 %v1289_v16 }
  0x20   :  { %1158 = vmatpush3.bf16.msra.mxu0 %v1289_v16 }
  0x21   :  { %1130 = vmatpush3.bf16.msra.mxu1 %v1283_v17  ;;  %v1290_v17 = vld [vmem:[%s1848_s5 + $0x8] sm:$0xff]  }
  0x22   :  { %1159 = vmatprep.subr.bf16.mxu0 %v1290_v17  ;;  %1235 = vmatprep.subr.mxu1 %v638_v19 }
  0x24   :  { %1160 = vmatpush3.bf16.msra.mxu0 %v1290_v17 }
  0x25   :  { %1161 = vmatprep.subr.bf16.mxu0 %v1291_v18 }
  0x28   :  { %1162 = vmatpush3.bf16.msra.mxu0 %v1291_v18 }
  0x29   :  { %1179 = vmatprep.subr.mxu0 %v638_v19 }
  0xc6   :  { %v1101_v23 = vpop.f32.mrf.mxu0 }
  0xc7   :  { %v169_v29 = vadd.f32 %v1101_v23, %v988_v25  ;;  %v1514_v23 = vld [vmem:[%s1850_s7 + $0x58] sm:$0xff] }
  0xc8   :  { %v160_v24 = vpop.f32.mrf.mxu0 }
  0xc9   :  { %v161_v27 = vadd.f32 %v988_v25, %v160_v24  ;;  %v225_v36 = vmax.f32 %v169_v29, 0.0  ;;  %v1521_v24 = vld [vmem:[%s1850_s7 + $0x50] sm:$0xff]  ;;  %v1556_v29 = vld [vmem:[%s1850_s7 + $0x28] sm:$0xff] }
  0xca   :  { %v1102_v26 = vpop.f32.mrf.mxu0 }
  0xcb   :  { %v172_v28 = vadd.f32 %v1102_v26, %v988_v25  ;;  %v223_v34 = vmax.f32 %v161_v27, 0.0  ;;  %v1535_v26 = vld [vmem:[%s1850_s7 + $0x40] sm:$0xff]  ;;  %v1542_v27 = vld [vmem:[%s1850_s7 + $0x38] sm:$0xff] }
  0xcc   :  { %v163_v30 = vpop.f32.mrf.mxu0 }
  0xcd   :  { %v164_v31 = vadd.f32 %v988_v25, %v163_v30  ;;  %v226_v32 = vmax.f32 %v172_v28, 0.0  ;;  %v1549_v28 = vld [vmem:[%s1850_s7 + $0x30] sm:$0xff] }
  0xce   :  { %v1105_v33 = vpop.f32.mrf.mxu0 }
  0xcf   :  { %v224_v35 = vmax.f32 %v164_v31, 0.0  ;;  %v240_v39 = vpack.c.bf16 %v226_v32, %v225_v36  ;;  %v185_v43 = vadd.f32 %v1105_v33, %v988_v25  ;;  %v1564_v32 = vld [vmem:[%s1851_s4] ss:$0 sm:$0xff] }
  0xd0   :  { %v176_v37 = vpop.f32.mrf.mxu0 }
  0xd1   :  { %v239_v38 = vpack.c.bf16 %v224_v35, %v223_v34  ;;  %v177_v41 = vadd.f32 %v988_v25, %v176_v37  ;;  %v229_v50 = vmax.f32 %v185_v43, 0.0 }
  0xd2   :  { %v1106_v40 = vpop.f32.mrf.mxu0 }
  0xd3   :  { %v188_v42 = vadd.f32 %v1106_v40, %v988_v25  ;;  %1131 = vmatprep.mubr.bf16.mxu1 %v239_v38  ;;  %v227_v48 = vmax.f32 %v177_v41, 0.0 }
  0xd4   :  { %v179_v44 = vpop.f32.mrf.mxu0  ;;  %1132 = vmatmul.mubr.bf16.vlgmr.msra.gmra.mxu1 %v240_v39 }
  0xd5   :  { %v180_v45 = vadd.f32 %v988_v25, %v179_v44  ;;  %v230_v46 = vmax.f32 %v188_v42, 0.0  ;;  %1251 = vmatpush3.msra.mxu1 %v638_v19 }
  0xd6   :  { %v1109_v47 = vpop.f32.mrf.mxu0  ;;  %1236 = vmatprep.subr.mxu1 %v637_v20 }
  0xd7   :  { %v228_v49 = vmax.f32 %v180_v45, 0.0  ;;  %v242_v53 = vpack.c.bf16 %v230_v46, %v229_v50  ;;  %v201_v57 = vadd.f32 %v1109_v47, %v988_v25  ;;  %1252 = vmatpush3.msra.mxu1 %v637_v20 }
  0xd8   :  { %v192_v51 = vpop.f32.mrf.mxu0  ;;  %1237 = vmatprep.subr.mxu1 %v1501_v21 }
  0xd9   :  { %v241_v52 = vpack.c.bf16 %v228_v49, %v227_v48  ;;  %v193_v55 = vadd.f32 %v988_v25, %v192_v51  ;;  %v233_v0 = vmax.f32 %v201_v57, 0.0  ;;  %1253 = vmatpush3.msra.mxu1 %v1501_v21 }
  0xda   :  { %v1110_v54 = vpop.f32.mrf.mxu0  ;;  %1238 = vmatprep.subr.mxu1 %v1507_v22 }
  0xdb   :  { %v204_v56 = vadd.f32 %v1110_v54, %v988_v25  ;;  %1135 = vmatprep.mubr.bf16.mxu1 %v241_v52  ;;  %v231_v62 = vmax.f32 %v193_v55, 0.0  ;;  %1254 = vmatpush3.msra.mxu1 %v1507_v22 }
  0xdc   :  { %v195_v58 = vpop.f32.mrf.mxu0  ;;  %1136 = vmatmul.mubr.bf16.gmra.mxu1 %v242_v53  ;;  %1239 = vmatprep.subr.mxu1 %v1514_v23 }
  0xdd   :  { %v196_v59 = vadd.f32 %v988_v25, %v195_v58  ;;  %v234_v60 = vmax.f32 %v204_v56, 0.0  ;;  %1255 = vmatpush3.msra.mxu1 %v1514_v23 }
  0xde   :  { %v1113_v61 = vpop.f32.mrf.mxu0  ;;  %1240 = vmatprep.subr.mxu1 %v1521_v24 }
  0xdf   :  { %v232_v63 = vmax.f32 %v196_v59, 0.0  ;;  %v244_v3 = vpack.c.bf16 %v234_v60, %v233_v0  ;;  %v217_v7 = vadd.f32 %v1113_v61, %v988_v25  ;;  %1256 = vmatpush3.msra.mxu1 %v1521_v24 }
  0xe0   :  { %v208_v1 = vpop.f32.mrf.mxu0 }
  0xe1   :  { %v243_v2 = vpack.c.bf16 %v232_v63, %v231_v62  ;;  %v209_v5 = vadd.f32 %v988_v25, %v208_v1  ;;  %v237_v13 = vmax.f32 %v217_v7, 0.0 }
  0xe2   :  { %v1114_v4 = vpop.f32.mrf.mxu0 }
  0xe3   :  { %v220_v6 = vadd.f32 %v1114_v4, %v988_v25  ;;  %1139 = vmatprep.mubr.bf16.mxu1 %v243_v2  ;;  %v235_v11 = vmax.f32 %v209_v5, 0.0 }
  0xe4   :  { %v211_v8 = vpop.f32.mrf.mxu0  ;;  %1140 = vmatmul.mubr.bf16.gmra.mxu1 %v244_v3 }
  0xe5   :  { %v212_v9 = vadd.f32 %v988_v25, %v211_v8  ;;  %v238_v10 = vmax.f32 %v220_v6, 0.0  ;;  %v1528_v25 = vld [vmem:[%s1850_s7 + $0x48] sm:$0xff] }
  0xe6   :  { %1241 = vmatprep.subr.mxu1 %v1528_v25 }
  0xe7   :  { %v236_v12 = vmax.f32 %v212_v9, 0.0  ;;  %v246_v15 = vpack.c.bf16 %v238_v10, %v237_v13  ;;  %1257 = vmatpush3.msra.mxu1 %v1528_v25 }
  0xe8   :  { %1242 = vmatprep.subr.mxu1 %v1535_v26 }
  0xe9   :  { %v245_v14 = vpack.c.bf16 %v236_v12, %v235_v11  ;;  %1258 = vmatpush3.msra.mxu1 %v1535_v26 }
  0xea   :  { %1243 = vmatprep.subr.mxu1 %v1542_v27 }
  0xeb   :  { %1143 = vmatprep.mubr.bf16.mxu1 %v245_v14  ;;  %1259 = vmatpush3.msra.mxu1 %v1542_v27 }
  0xec   :  { %1144 = vmatmul.mubr.bf16.gmra.mxu1 %v246_v15  ;;  %1244 = vmatprep.subr.mxu1 %v1549_v28 }
  0xed   :  { %1260 = vmatpush3.msra.mxu1 %v1549_v28 }
  0xee   :  { %1245 = vmatprep.subr.mxu1 %v1556_v29 }
  0xef   :  { %1261 = vmatpush3.msra.mxu1 %v1556_v29 }
 0x194   :  { %v1133_v30 = vpop.f32.mrf.mxu1 }
 0x195   :  { %v361_v36 = vadd.f32 %v1133_v30, %v1564_v32 }
 0x196   :  { %v352_v31 = vpop.f32.mrf.mxu1 }
 0x197   :  { %v353_v34 = vadd.f32 %v1564_v32, %v352_v31  ;;  %v417_v43 = vmax.f32 %v361_v36, 0.0 }
 0x198   :  { %v1134_v33 = vpop.f32.mrf.mxu1 }
 0x199   :  { %v364_v35 = vadd.f32 %v1134_v33, %v1564_v32  ;;  %v415_v41 = vmax.f32 %v353_v34, 0.0 }
 0x19a   :  { %v355_v37 = vpop.f32.mrf.mxu1 }
 0x19b   :  { %v356_v38 = vadd.f32 %v1564_v32, %v355_v37  ;;  %v418_v39 = vmax.f32 %v364_v35, 0.0 }
 0x19c   :  { %v1137_v40 = vpop.f32.mrf.mxu1 }
 0x19d   :  { %v416_v42 = vmax.f32 %v356_v38, 0.0  ;;  %v432_v46 = vpack.c.bf16 %v418_v39, %v417_v43  ;;  %v377_v50 = vadd.f32 %v1137_v40, %v1564_v32 }
 0x19e   :  { %v368_v44 = vpop.f32.mrf.mxu1 }
 0x19f   :  { %v431_v45 = vpack.c.bf16 %v416_v42, %v415_v41  ;;  %v369_v48 = vadd.f32 %v1564_v32, %v368_v44  ;;  %v421_v57 = vmax.f32 %v377_v50, 0.0 }
 0x1a0   :  { %v1138_v47 = vpop.f32.mrf.mxu1 }
 0x1a1   :  { %v380_v49 = vadd.f32 %v1138_v47, %v1564_v32  ;;  %1163 = vmatprep.mubr.bf16.mxu0 %v431_v45  ;;  %v419_v55 = vmax.f32 %v369_v48, 0.0 }
 0x1a2   :  { %v371_v51 = vpop.f32.mrf.mxu1  ;;  %1164 = vmatmul.mubr.bf16.vlgmr.msra.gmra.mxu0 %v432_v46 }
 0x1a3   :  { %v372_v52 = vadd.f32 %v1564_v32, %v371_v51  ;;  %1180 = vmatpush3.msra.mxu0 %v638_v19  ;;  %v422_v53 = vmax.f32 %v380_v49, 0.0 }
 0x1a4   :  { %v1141_v54 = vpop.f32.mrf.mxu1  ;;  %1181 = vmatprep.subr.mxu0 %v637_v20 }
 0x1a5   :  { %v420_v56 = vmax.f32 %v372_v52, 0.0  ;;  %1182 = vmatpush3.msra.mxu0 %v637_v20  ;;  %v434_v60 = vpack.c.bf16 %v422_v53, %v421_v57  ;;  %v393_v0 = vadd.f32 %v1141_v54, %v1564_v32 }
 0x1a6   :  { %v384_v58 = vpop.f32.mrf.mxu1  ;;  %1183 = vmatprep.subr.mxu0 %v1501_v21 }
 0x1a7   :  { %v433_v59 = vpack.c.bf16 %v420_v56, %v419_v55  ;;  %1184 = vmatpush3.msra.mxu0 %v1501_v21  ;;  %v385_v62 = vadd.f32 %v1564_v32, %v384_v58  ;;  %v425_v7 = vmax.f32 %v393_v0, 0.0 }
 0x1a8   :  { %v1142_v61 = vpop.f32.mrf.mxu1  ;;  %1185 = vmatprep.subr.mxu0 %v1507_v22 }
 0x1a9   :  { %v396_v63 = vadd.f32 %v1142_v61, %v1564_v32  ;;  %1167 = vmatprep.mubr.bf16.mxu0 %v433_v59  ;;  %1186 = vmatpush3.msra.mxu0 %v1507_v22  ;;  %v423_v5 = vmax.f32 %v385_v62, 0.0 }
 0x1aa   :  { %v387_v1 = vpop.f32.mrf.mxu1  ;;  %1168 = vmatmul.mubr.bf16.gmra.mxu0 %v434_v60  ;;  %1187 = vmatprep.subr.mxu0 %v1514_v23 }
 0x1ab   :  { %v388_v2 = vadd.f32 %v1564_v32, %v387_v1  ;;  %1188 = vmatpush3.msra.mxu0 %v1514_v23  ;;  %v426_v3 = vmax.f32 %v396_v63, 0.0  ;;  %v627_v23 = vld [vmem:[%s1850_s7 + $0x20] sm:$0xff] }
 0x1ac   :  { %v1145_v4 = vpop.f32.mrf.mxu1  ;;  %1189 = vmatprep.subr.mxu0 %v1521_v24  ;;  %1246 = vmatprep.subr.mxu1 %v627_v23 }
 0x1ad   :  { %v424_v6 = vmax.f32 %v388_v2, 0.0  ;;  %1190 = vmatpush3.msra.mxu0 %v1521_v24  ;;  %v436_v10 = vpack.c.bf16 %v426_v3, %v425_v7  ;;  %v409_v14 = vadd.f32 %v1145_v4, %v1564_v32  ;;  %v626_v24 = vld [vmem:[%s1850_s7 + $0x18] sm:$0xff]  ;;  %1262 = vmatpush3.msra.mxu1 %v627_v23 }
 0x1ae   :  { %v400_v8 = vpop.f32.mrf.mxu1  ;;  %1191 = vmatprep.subr.mxu0 %v1528_v25  ;;  %1247 = vmatprep.subr.mxu1 %v626_v24 }
 0x1af   :  { %v435_v9 = vpack.c.bf16 %v424_v6, %v423_v5  ;;  %1192 = vmatpush3.msra.mxu0 %v1528_v25  ;;  %v401_v12 = vadd.f32 %v1564_v32, %v400_v8  ;;  %v429_v20 = vmax.f32 %v409_v14, 0.0  ;;  %v625_v25 = vld [vmem:[%s1850_s7 + $0x10] sm:$0xff]  ;;  %1263 = vmatpush3.msra.mxu1 %v626_v24 }
 0x1b0   :  { %v1146_v11 = vpop.f32.mrf.mxu1  ;;  %1193 = vmatprep.subr.mxu0 %v1535_v26  ;;  %1248 = vmatprep.subr.mxu1 %v625_v25 }
 0x1b1   :  { %v412_v13 = vadd.f32 %v1146_v11, %v1564_v32  ;;  %1171 = vmatprep.mubr.bf16.mxu0 %v435_v9  ;;  %1194 = vmatpush3.msra.mxu0 %v1535_v26  ;;  %v427_v18 = vmax.f32 %v401_v12, 0.0  ;;  %v624_v26 = vld [vmem:[%s1850_s7 + $0x8] sm:$0xff] }
 0x1b2   :  { %v403_v15 = vpop.f32.mrf.mxu1  ;;  %1172 = vmatmul.mubr.bf16.gmra.mxu0 %v436_v10  ;;  %1195 = vmatprep.subr.mxu0 %v1542_v27 }
 0x1b3   :  { %v404_v16 = vadd.f32 %v1564_v32, %v403_v15  ;;  %1196 = vmatpush3.msra.mxu0 %v1542_v27  ;;  %v430_v17 = vmax.f32 %v412_v13, 0.0  ;;  %1264 = vmatpush3.msra.mxu1 %v625_v25  ;;  %v623_v27 = vld [vmem:[%s1850_s7] sm:$0xff] }
 0x1b4   :  { %1197 = vmatprep.subr.mxu0 %v1549_v28  ;;  %1249 = vmatprep.subr.mxu1 %v624_v26  ;;  %v1023_v13 = vld [vmem:[%s1853_s8] ss:$0 sm:$0xff] }
 0x1b5   :  { %v428_v19 = vmax.f32 %v404_v16, 0.0  ;;  %1198 = vmatpush3.msra.mxu0 %v1549_v28  ;;  %v438_v22 = vpack.c.bf16 %v430_v17, %v429_v20  ;;  %1265 = vmatpush3.msra.mxu1 %v624_v26 }
 0x1b6   :  { %1199 = vmatprep.subr.mxu0 %v1556_v29  ;;  %1250 = vmatprep.subr.mxu1 %v623_v27 }
 0x1b7   :  { %v437_v21 = vpack.c.bf16 %v428_v19, %v427_v18  ;;  %1200 = vmatpush3.msra.mxu0 %v1556_v29  ;;  %1266 = vmatpush3.msra.mxu1 %v623_v27  ;;  %v1014_v29 = vld [vmem:[%s1852_s6] ss:$0 sm:$0xff] }
 0x1b8   :  { %1201 = vmatprep.subr.mxu0 %v627_v23 }
 0x1b9   :  { %1175 = vmatprep.mubr.bf16.mxu0 %v437_v21  ;;  %1202 = vmatpush3.msra.mxu0 %v627_v23 }
 0x1ba   :  { %1176 = vmatmul.mubr.bf16.gmra.mxu0 %v438_v22  ;;  %1203 = vmatprep.subr.mxu0 %v626_v24 }
 0x1bb   :  { %1204 = vmatpush3.msra.mxu0 %v626_v24 }
 0x1bc   :  { %1205 = vmatprep.subr.mxu0 %v625_v25 }
 0x1bd   :  { %1206 = vmatpush3.msra.mxu0 %v625_v25 }
 0x1be   :  { %1207 = vmatprep.subr.mxu0 %v624_v26 }
 0x1bf   :  { %1208 = vmatpush3.msra.mxu0 %v624_v26 }
 0x1c0   :  { %1209 = vmatprep.subr.mxu0 %v623_v27 }
 0x1c1   :  { %1210 = vmatpush3.msra.mxu0 %v623_v27 }
 0x262   :  { %v1165_v28 = vpop.f32.mrf.mxu0 }
 0x263   :  { %v553_v34 = vadd.f32 %v1165_v28, %v1014_v29 }
 0x264   :  { %v544_v30 = vpop.f32.mrf.mxu0 }
 0x265   :  { %v545_v31 = vadd.f32 %v1014_v29, %v544_v30  ;;  %v609_v41 = vmax.f32 %v553_v34, 0.0 }
 0x266   :  { %v1166_v32 = vpop.f32.mrf.mxu0 }
 0x267   :  { %v607_v33 = vmax.f32 %v545_v31, 0.0  ;;  %v556_v38 = vadd.f32 %v1166_v32, %v1014_v29 }
 0x268   :  { %v547_v35 = vpop.f32.mrf.mxu0 }
 0x269   :  { %v548_v36 = vadd.f32 %v1014_v29, %v547_v35  ;;  %1211 = vmatprep.mubr.f32.mxu0 %v607_v33  ;;  %v610_v46 = vmax.f32 %v556_v38, 0.0 }
 0x26a   :  { %v1169_v37 = vpop.f32.mrf.mxu0 }
 0x26b   :  { %v608_v39 = vmax.f32 %v548_v36, 0.0  ;;  %v569_v40 = vadd.f32 %v1169_v37, %v1014_v29 }
 0x26c   :  { %v560_v42 = vpop.f32.mrf.mxu0 }
 0x26d   :  { %v613_v43 = vmax.f32 %v569_v40, 0.0  ;;  %v561_v44 = vadd.f32 %v1014_v29, %v560_v42  ;;  %1212 = vmatmul.mubr.f32.vlgmr.msra.gmra.mxu0 %v608_v39 }
 0x26e   :  { %v1170_v45 = vpop.f32.mrf.mxu0  ;;  %1214 = vmatprep.mubr.f32.mxu0 %v609_v41 }
 0x26f   :  { %v611_v47 = vmax.f32 %v561_v44, 0.0  ;;  %v572_v48 = vadd.f32 %v1170_v45, %v1014_v29  ;;  %1220 = vmatprep.mubr.f32.mxu1 %v613_v43 }
 0x270   :  { %v563_v49 = vpop.f32.mrf.mxu0 }
 0x271   :  { %v614_v50 = vmax.f32 %v572_v48, 0.0  ;;  %v564_v51 = vadd.f32 %v1014_v29, %v563_v49  ;;  %1215 = vmatmul.mubr.f32.gmra.mxu0 %v610_v46 }
 0x272   :  { %v1173_v52 = vpop.f32.mrf.mxu0  ;;  %1217 = vmatprep.mubr.f32.mxu0 %v611_v47 }
 0x273   :  { %v612_v53 = vmax.f32 %v564_v51, 0.0  ;;  %1221 = vmatmul.mubr.f32.vlgmr.msra.gmra.mxu1 %v614_v50  ;;  %v585_v58 = vadd.f32 %v1173_v52, %v1014_v29 }
 0x274   :  { %v576_v54 = vpop.f32.mrf.mxu0 }
 0x275   :  { %v577_v55 = vadd.f32 %v1014_v29, %v576_v54  ;;  %1218 = vmatmul.mubr.f32.gmra.mxu0 %v612_v53  ;;  %v617_v0 = vmax.f32 %v585_v58, 0.0 }
 0x276   :  { %v1174_v56 = vpop.f32.mrf.mxu0 }
 0x277   :  { %v615_v57 = vmax.f32 %v577_v55, 0.0  ;;  %v588_v62 = vadd.f32 %v1174_v56, %v1014_v29 }
 0x278   :  { %v579_v59 = vpop.f32.mrf.mxu0 }
 0x279   :  { %v580_v60 = vadd.f32 %v1014_v29, %v579_v59  ;;  %1223 = vmatprep.mubr.f32.mxu1 %v615_v57  ;;  %v618_v4 = vmax.f32 %v588_v62, 0.0 }
 0x27a   :  { %v1177_v61 = vpop.f32.mrf.mxu0 }
 0x27b   :  { %v616_v63 = vmax.f32 %v580_v60, 0.0  ;;  %v601_v6 = vadd.f32 %v1177_v61, %v1014_v29 }
 0x27c   :  { %v592_v1 = vpop.f32.mrf.mxu0 }
 0x27d   :  { %v593_v2 = vadd.f32 %v1014_v29, %v592_v1  ;;  %1224 = vmatmul.mubr.f32.gmra.mxu1 %v616_v63  ;;  %v621_v11 = vmax.f32 %v601_v6, 0.0 }
 0x27e   :  { %v1178_v3 = vpop.f32.mrf.mxu0  ;;  %1226 = vmatprep.mubr.f32.mxu1 %v617_v0 }
 0x27f   :  { %v619_v5 = vmax.f32 %v593_v2, 0.0  ;;  %v604_v9 = vadd.f32 %v1178_v3, %v1014_v29 }
 0x280   :  { %v595_v7 = vpop.f32.mrf.mxu0 }
 0x281   :  { %v596_v8 = vadd.f32 %v1014_v29, %v595_v7  ;;  %1227 = vmatmul.mubr.f32.gmra.mxu1 %v618_v4  ;;  %v622_v12 = vmax.f32 %v604_v9, 0.0 }
 0x282   :  { %1229 = vmatprep.mubr.f32.mxu1 %v619_v5 }
 0x283   :  { %v620_v10 = vmax.f32 %v596_v8, 0.0 }
 0x285   :  { %1230 = vmatmul.mubr.f32.gmra.mxu1 %v620_v10 }
 0x286   :  { %1232 = vmatprep.mubr.f32.mxu1 %v621_v11 }
 0x289   :  { %1233 = vmatmul.mubr.f32.gmra.mxu1 %v622_v12 }
 0x32d   :  { %v1213_v14 = vpop.f32.mrf.mxu0 }
 0x32e   :  { %v1621_v15 = vadd.f32 %v1213_v14, %v1023_v13 }
 0x32f   :  { %v712_v16 = vpop.f32.mrf.mxu0 }
 0x330   :  { %v1623_v17 = vadd.f32 %v1023_v13, %v712_v16  ;;  %v795_v18 = vsel %vm791_vm2, %v1621_v15, -inf }
 0x331   :  { %796 = vmax.xlane.f32.xlu0 %v795_v18  ;;  %v1216_v19 = vpop.f32.mrf.mxu0 }
 0x332   :  { %v1627_v20 = vadd.f32 %v1216_v19, %v1023_v13  ;;  %v792_v25 = vsel %vm791_vm2, %v1623_v17, -inf }
 0x333   :  { %v722_v21 = vpop.f32.mrf.mxu0  ;;  %v1222_v22 = vpop.f32.mrf.mxu1 }
 0x334   :  { %v1629_v23 = vadd.f32 %v1023_v13, %v722_v21  ;;  %v801_v24 = vsel %vm791_vm2, %v1627_v20, -inf  ;;  %v1637_v30 = vadd.f32 %v1222_v22, %v1023_v13 }
 0x335   :  { %v742_v26 = vpop.f32.mrf.mxu1  ;;  %802 = vmax.xlane.f32.xlu1 %v801_v24  ;;  %v1219_v27 = vpop.f32.mrf.mxu0  ;;  %793 = vmax.xlane.f32.xlu0 %v792_v25 }
 0x336   :  { %v1635_v28 = vadd.f32 %v1023_v13, %v742_v26  ;;  %v798_v32 = vsel %vm791_vm2, %v1629_v23, -inf  ;;  %v1645_v34 = vadd.f32 %v1219_v27, %v1023_v13  ;;  %v813_v35 = vsel %vm791_vm2, %v1637_v30, -inf }
 0x337   :  { %v732_v29 = vpop.f32.mrf.mxu0 }
 0x338   :  { %v1639_v31 = vadd.f32 %v1023_v13, %v732_v29  ;;  %v810_v33 = vsel %vm791_vm2, %v1635_v28, -inf  ;;  %v807_v41 = vsel %vm791_vm2, %v1645_v34, -inf }
 0x339   :  { %799 = vmax.xlane.f32.xlu1 %v798_v32  ;;  %811 = vmax.xlane.f32.xlu0 %v810_v33 }
 0x33a   :  { %v804_v36 = vsel %vm791_vm2, %v1639_v31, -inf }
 0x33d   :  { %v1225_v37 = vpop.f32.mrf.mxu1  ;;  %814 = vmax.xlane.f32.xlu1 %v813_v35  ;;  %805 = vmax.xlane.f32.xlu0 %v804_v36 }
 0x33e   :  { %v1651_v39 = vadd.f32 %v1225_v37, %v1023_v13 }
 0x33f   :  { %v752_v38 = vpop.f32.mrf.mxu1 }
 0x340   :  { %v1653_v40 = vadd.f32 %v1023_v13, %v752_v38  ;;  %v819_v47 = vsel %vm791_vm2, %v1651_v39, -inf }
 0x341   :  { %v1228_v42 = vpop.f32.mrf.mxu1  ;;  %808 = vmax.xlane.f32.xlu1 %v807_v41 }
 0x342   :  { %v816_v43 = vsel %vm791_vm2, %v1653_v40, -inf  ;;  %v1659_v45 = vadd.f32 %v1228_v42, %v1023_v13 }
 0x343   :  { %v762_v44 = vpop.f32.mrf.mxu1  ;;  %817 = vmax.xlane.f32.xlu0 %v816_v43 }
 0x344   :  { %v1661_v46 = vadd.f32 %v1023_v13, %v762_v44  ;;  %v825_v53 = vsel %vm791_vm2, %v1659_v45, -inf }
 0x345   :  { %v1231_v48 = vpop.f32.mrf.mxu1  ;;  %820 = vmax.xlane.f32.xlu1 %v819_v47 }
 0x346   :  { %v822_v49 = vsel %vm791_vm2, %v1661_v46, -inf  ;;  %v1667_v51 = vadd.f32 %v1231_v48, %v1023_v13 }
 0x347   :  { %v772_v50 = vpop.f32.mrf.mxu1  ;;  %823 = vmax.xlane.f32.xlu0 %v822_v49 }
 0x348   :  { %v1669_v52 = vadd.f32 %v1023_v13, %v772_v50  ;;  %v831_v59 = vsel %vm791_vm2, %v1667_v51, -inf }
 0x349   :  { %v1234_v54 = vpop.f32.mrf.mxu1  ;;  %826 = vmax.xlane.f32.xlu1 %v825_v53 }
 0x34a   :  { %v828_v55 = vsel %vm791_vm2, %v1669_v52, -inf  ;;  %v1675_v57 = vadd.f32 %v1234_v54, %v1023_v13 }
 0x34b   :  { %v782_v56 = vpop.f32.mrf.mxu1  ;;  %829 = vmax.xlane.f32.xlu0 %v828_v55 }
 0x34c   :  { %v1677_v58 = vadd.f32 %v1023_v13, %v782_v56  ;;  %v837_v61 = vsel %vm791_vm2, %v1675_v57, -inf }
 0x34d   :  { %832 = vmax.xlane.f32.xlu1 %v831_v59 }
 0x34e   :  { %v834_v60 = vsel %vm791_vm2, %v1677_v58, -inf }
 0x34f   :  { %835 = vmax.xlane.f32.xlu0 %v834_v60 }
 0x351   :  { %838 = vmax.xlane.f32.xlu1 %v837_v61 }
 0x3ba   :  { %v797_v62 = vpop.xlane.xlu0 %796 }
 0x3bb   :  { %v841_v63 = vsub.f32 %v1621_v15, %v797_v62 }
 0x3bd   :  { %v858_v0 = vmul.f32 1.442695, %v841_v63 }
 0x3be   :  { %v803_v1 = vpop.xlane.xlu1 %802  ;;  %v794_v2 = vpop.xlane.xlu0 %793 }
 0x3bf   :  { %1292 = vpow2.f32 %v858_v0  ;;  %v843_v3 = vsub.f32 %v1627_v20, %v803_v1  ;;  %v840_v4 = vsub.f32 %v1623_v17, %v794_v2 }
 0x3c1   :  { %v862_v5 = vmul.f32 1.442695, %v843_v3  ;;  %v856_v6 = vmul.f32 1.442695, %v840_v4 }
 0x3c2   :  { %v800_v7 = vpop.xlane.xlu1 %799  ;;  %v812_v8 = vpop.xlane.xlu0 %811 }
 0x3c3   :  { %1294 = vpow2.f32 %v862_v5  ;;  %v842_v9 = vsub.f32 %v1629_v23, %v800_v7  ;;  %v846_v10 = vsub.f32 %v1635_v28, %v812_v8 }
 0x3c4   :  { %1296 = vpow2.f32 %v856_v6 }
 0x3c5   :  { %v860_v11 = vmul.f32 1.442695, %v842_v9  ;;  %v868_v12 = vmul.f32 1.442695, %v846_v10 }
 0x3c6   :  { %v815_v13 = vpop.xlane.xlu1 %814  ;;  %v806_v14 = vpop.xlane.xlu0 %805 }
 0x3c7   :  { %1298 = vpow2.f32 %v860_v11  ;;  %v847_v15 = vsub.f32 %v1637_v30, %v815_v13  ;;  %v844_v16 = vsub.f32 %v1639_v31, %v806_v14 }
 0x3c8   :  { %1300 = vpow2.f32 %v868_v12 }
 0x3c9   :  { %v870_v17 = vmul.f32 1.442695, %v847_v15  ;;  %v864_v18 = vmul.f32 1.442695, %v844_v16 }
 0x3ca   :  { %v809_v19 = vpop.xlane.xlu1 %808 }
 0x3cb   :  { %1302 = vpow2.f32 %v870_v17  ;;  %v845_v20 = vsub.f32 %v1645_v34, %v809_v19 }
 0x3cc   :  { %v1693_v21 = vpop.eup %1292  ;;  %v818_v22 = vpop.xlane.xlu0 %817  ;;  %1304 = vpow2.f32 %v864_v18 }
 0x3cd   :  { %v866_v23 = vmul.f32 1.442695, %v845_v20  ;;  %v848_v24 = vsub.f32 %v1653_v40, %v818_v22  ;;  %v891_v25 = vsel %vm791_vm2, %v1693_v21, 0.0 }
 0x3ce   :  { %892 = vadd.xlane.f32.xlu1 %v891_v25  ;;  %v821_v26 = vpop.xlane.xlu1 %820 }
 0x3cf   :  { %1306 = vpow2.f32 %v866_v23  ;;  %v872_v27 = vmul.f32 1.442695, %v848_v24  ;;  %v849_v28 = vsub.f32 %v1651_v39, %v821_v26 }
 0x3d0   :  { %v1699_v29 = vpop.eup %1294  ;;  %v824_v30 = vpop.xlane.xlu0 %823 }
 0x3d1   :  { %v1701_v31 = vpop.eup %1296  ;;  %v874_v32 = vmul.f32 1.442695, %v849_v28  ;;  %v850_v33 = vsub.f32 %v1661_v46, %v824_v30  ;;  %v897_v34 = vsel %vm791_vm2, %v1699_v29, 0.0  ;;  %1308 = vpow2.f32 %v872_v27 }
 0x3d2   :  { %898 = vadd.xlane.f32.xlu1 %v897_v34  ;;  %v827_v35 = vpop.xlane.xlu1 %826  ;;  %v888_v36 = vsel %vm791_vm2, %v1701_v31, 0.0 }
 0x3d3   :  { %1310 = vpow2.f32 %v874_v32  ;;  %v876_v37 = vmul.f32 1.442695, %v850_v33  ;;  %v851_v38 = vsub.f32 %v1659_v45, %v827_v35  ;;  %889 = vadd.xlane.f32.xlu0 %v888_v36 }
 0x3d4   :  { %v1709_v39 = vpop.eup %1298  ;;  %v830_v40 = vpop.xlane.xlu0 %829 }
 0x3d5   :  { %v878_v41 = vmul.f32 1.442695, %v851_v38  ;;  %v852_v42 = vsub.f32 %v1669_v52, %v830_v40  ;;  %v894_v43 = vsel %vm791_vm2, %v1709_v39, 0.0  ;;  %1312 = vpow2.f32 %v876_v37  ;;  %v1714_v46 = vpop.eup %1300 }
 0x3d6   :  { %v833_v44 = vpop.xlane.xlu1 %832  ;;  %v906_v55 = vsel %vm791_vm2, %v1714_v46, 0.0 }
 0x3d7   :  { %1314 = vpow2.f32 %v878_v41  ;;  %v880_v47 = vmul.f32 1.442695, %v852_v42  ;;  %v853_v48 = vsub.f32 %v1667_v51, %v833_v44  ;;  %895 = vadd.xlane.f32.xlu0 %v894_v43 }
 0x3d8   :  { %v1717_v45 = vpop.eup %1302  ;;  %v836_v49 = vpop.xlane.xlu0 %835 }
 0x3d9   :  { %v882_v50 = vmul.f32 1.442695, %v853_v48  ;;  %v854_v53 = vsub.f32 %v1677_v58, %v836_v49  ;;  %v909_v52 = vsel %vm791_vm2, %v1717_v45, 0.0  ;;  %1316 = vpow2.f32 %v880_v47  ;;  %v1724_v56 = vpop.eup %1304 }
 0x3da   :  { %910 = vadd.xlane.f32.xlu1 %v909_v52  ;;  %v839_v54 = vpop.xlane.xlu1 %838  ;;  %v900_v62 = vsel %vm791_vm2, %v1724_v56, 0.0 }
 0x3db   :  { %1318 = vpow2.f32 %v882_v50  ;;  %v884_v51 = vmul.f32 1.442695, %v854_v53  ;;  %v855_v59 = vsub.f32 %v1675_v57, %v839_v54  ;;  %907 = vadd.xlane.f32.xlu0 %v906_v55 }
 0x3dc   :  { %v1727_v60 = vpop.eup %1306 }
 0x3dd   :  { %v886_v61 = vmul.f32 1.442695, %v855_v59  ;;  %v903_v58 = vsel %vm791_vm2, %v1727_v60, 0.0  ;;  %1320 = vpow2.f32 %v884_v51 }
 0x3de   :  { %904 = vadd.xlane.f32.xlu1 %v903_v58  ;;  %v1733_v63 = vpop.eup %1308 }
 0x3df   :  { %1322 = vpow2.f32 %v886_v61  ;;  %901 = vadd.xlane.f32.xlu0 %v900_v62  ;;  %v912_v1 = vsel %vm791_vm2, %v1733_v63, 0.0 }
 0x3e0   :  { %v1735_v0 = vpop.eup %1310 }
 0x3e1   :  { %v915_v57 = vsel %vm791_vm2, %v1735_v0, 0.0 }
 0x3e2   :  { %916 = vadd.xlane.f32.xlu1 %v915_v57  ;;  %v1741_v2 = vpop.eup %1312 }
 0x3e3   :  { %913 = vadd.xlane.f32.xlu0 %v912_v1  ;;  %v918_v5 = vsel %vm791_vm2, %v1741_v2, 0.0 }
 0x3e4   :  { %v1743_v3 = vpop.eup %1314 }
 0x3e5   :  { %v921_v4 = vsel %vm791_vm2, %v1743_v3, 0.0 }
 0x3e6   :  { %922 = vadd.xlane.f32.xlu1 %v921_v4  ;;  %v1749_v6 = vpop.eup %1316 }
 0x3e7   :  { %919 = vadd.xlane.f32.xlu0 %v918_v5  ;;  %v924_v9 = vsel %vm791_vm2, %v1749_v6, 0.0 }
 0x3e8   :  { %v1751_v7 = vpop.eup %1318 }
 0x3e9   :  { %v927_v8 = vsel %vm791_vm2, %v1751_v7, 0.0 }
 0x3ea   :  { %928 = vadd.xlane.f32.xlu1 %v927_v8  ;;  %v1757_v10 = vpop.eup %1320 }
 0x3eb   :  { %925 = vadd.xlane.f32.xlu0 %v924_v9  ;;  %v930_v13 = vsel %vm791_vm2, %v1757_v10, 0.0 }
 0x3ec   :  { %v1759_v11 = vpop.eup %1322 }
 0x3ed   :  { %v933_v12 = vsel %vm791_vm2, %v1759_v11, 0.0 }
 0x3ee   :  { %934 = vadd.xlane.f32.xlu1 %v933_v12 }
 0x3ef   :  { %931 = vadd.xlane.f32.xlu0 %v930_v13 }
 0x457   :  { %v893_v14 = vpop.xlane.xlu1 %892 }
 0x458   :  { %1324 = vrcp.f32 %v893_v14 }
 0x45b   :  { %v899_v15 = vpop.xlane.xlu1 %898 }
 0x45c   :  { %1326 = vrcp.f32 %v899_v15  ;;  %v890_v16 = vpop.xlane.xlu0 %889 }
 0x45d   :  { %1328 = vrcp.f32 %v890_v16 }
 0x460   :  { %v896_v17 = vpop.xlane.xlu0 %895 }
 0x461   :  { %1330 = vrcp.f32 %v896_v17 }
 0x463   :  { %v911_v18 = vpop.xlane.xlu1 %910 }
 0x464   :  { %1332 = vrcp.f32 %v911_v18  ;;  %v908_v19 = vpop.xlane.xlu0 %907 }
 0x465   :  { %v1325_v20 = vpop.eup %1324  ;;  %1334 = vrcp.f32 %v908_v19 }
 0x466   :  { %v939_v22 = vmul.f32 %v1325_v20, %v1693_v21 }
 0x467   :  { %v905_v23 = vpop.xlane.xlu1 %904 }
 0x468   :  { %969 = vst.msk [vmem:[%s1854_s9 + $0x8] sm:$0xff] %vm791_vm2, %v939_v22  ;;  %1336 = vrcp.f32 %v905_v23  ;;  %v902_v24 = vpop.xlane.xlu0 %901 }
 0x469   :  { %v1327_v25 = vpop.eup %1326  ;;  %1338 = vrcp.f32 %v902_v24 }
 0x46a   :  { %v1329_v26 = vpop.eup %1328  ;;  %v943_v27 = vmul.f32 %v1327_v25, %v1699_v29 }
 0x46b   :  { %v937_v28 = vmul.f32 %v1329_v26, %v1701_v31  ;;  %v917_v30 = vpop.xlane.xlu1 %916 }
 0x46c   :  { %971 = vst.msk [vmem:[%s1854_s9 + $0x18] sm:$0xff] %vm791_vm2, %v943_v27  ;;  %1340 = vrcp.f32 %v917_v30  ;;  %v914_v21 = vpop.xlane.xlu0 %913 }
 0x46d   :  { %968 = vst.msk [vmem:[%s1854_s9] sm:$0xff] %vm791_vm2, %v937_v28  ;;  %1342 = vrcp.f32 %v914_v21 }
 0x46e   :  { %v1331_v32 = vpop.eup %1330 }
 0x46f   :  { %v941_v33 = vmul.f32 %v1331_v32, %v1709_v39  ;;  %v923_v29 = vpop.xlane.xlu1 %922 }
 0x470   :  { %1344 = vrcp.f32 %v923_v29  ;;  %v920_v31 = vpop.xlane.xlu0 %919 }
 0x471   :  { %v1333_v34 = vpop.eup %1332  ;;  %970 = vst.msk [vmem:[%s1854_s9 + $0x10] sm:$0xff] %vm791_vm2, %v941_v33  ;;  %1346 = vrcp.f32 %v920_v31 }
 0x472   :  { %v1335_v35 = vpop.eup %1334  ;;  %v951_v36 = vmul.f32 %v1333_v34, %v1717_v45 }
 0x473   :  { %v949_v37 = vmul.f32 %v1335_v35, %v1714_v46  ;;  %v929_v38 = vpop.xlane.xlu1 %928 }
 0x474   :  { %975 = vst.msk [vmem:[%s1854_s9 + $0x38] sm:$0xff] %vm791_vm2, %v951_v36  ;;  %1348 = vrcp.f32 %v929_v38  ;;  %v926_v39 = vpop.xlane.xlu0 %925 }
 0x475   :  { %v1337_v40 = vpop.eup %1336  ;;  %974 = vst.msk [vmem:[%s1854_s9 + $0x30] sm:$0xff] %vm791_vm2, %v949_v37  ;;  %1350 = vrcp.f32 %v926_v39 }
 0x476   :  { %v1339_v41 = vpop.eup %1338  ;;  %v947_v42 = vmul.f32 %v1337_v40, %v1727_v60 }
 0x477   :  { %v945_v43 = vmul.f32 %v1339_v41, %v1724_v56  ;;  %v935_v44 = vpop.xlane.xlu1 %934 }
 0x478   :  { %973 = vst.msk [vmem:[%s1854_s9 + $0x28] sm:$0xff] %vm791_vm2, %v947_v42  ;;  %1352 = vrcp.f32 %v935_v44  ;;  %v932_v46 = vpop.xlane.xlu0 %931 }
 0x479   :  { %v1341_v47 = vpop.eup %1340  ;;  %972 = vst.msk [vmem:[%s1854_s9 + $0x20] sm:$0xff] %vm791_vm2, %v945_v43  ;;  %1354 = vrcp.f32 %v932_v46 }
 0x47a   :  { %v1343_v48 = vpop.eup %1342  ;;  %v955_v45 = vmul.f32 %v1341_v47, %v1735_v0 }
 0x47b   :  { %v953_v49 = vmul.f32 %v1343_v48, %v1733_v63 }
 0x47c   :  { %977 = vst.msk [vmem:[%s1854_s9 + $0x48] sm:$0xff] %vm791_vm2, %v955_v45 }
 0x47d   :  { %v1345_v50 = vpop.eup %1344  ;;  %976 = vst.msk [vmem:[%s1854_s9 + $0x40] sm:$0xff] %vm791_vm2, %v953_v49 }
 0x47e   :  { %v1347_v53 = vpop.eup %1346  ;;  %v959_v52 = vmul.f32 %v1345_v50, %v1743_v3 }
 0x47f   :  { %v957_v54 = vmul.f32 %v1347_v53, %v1741_v2 }
 0x480   :  { %979 = vst.msk [vmem:[%s1854_s9 + $0x58] sm:$0xff] %vm791_vm2, %v959_v52 }
 0x481   :  { %v1349_v55 = vpop.eup %1348  ;;  %978 = vst.msk [vmem:[%s1854_s9 + $0x50] sm:$0xff] %vm791_vm2, %v957_v54 }
 0x482   :  { %v1351_v56 = vpop.eup %1350  ;;  %v963_v51 = vmul.f32 %v1349_v55, %v1751_v7 }
 0x483   :  { %v961_v59 = vmul.f32 %v1351_v56, %v1749_v6 }
 0x484   :  { %981 = vst.msk [vmem:[%s1854_s9 + $0x68] sm:$0xff] %vm791_vm2, %v963_v51 }
 0x485   :  { %v1353_v60 = vpop.eup %1352  ;;  %980 = vst.msk [vmem:[%s1854_s9 + $0x60] sm:$0xff] %vm791_vm2, %v961_v59 }
 0x486   :  { %v1355_v61 = vpop.eup %1354  ;;  %v967_v58 = vmul.f32 %v1353_v60, %v1759_v11 }
 0x487   :  { %v965_v62 = vmul.f32 %v1355_v61, %v1757_v10 }
 0x488   :  { %983 = vst.msk [vmem:[%s1854_s9 + $0x78] sm:$0xff] %vm791_vm2, %v967_v58 }
 0x489   :  { %982 = vst.msk [vmem:[%s1854_s9 + $0x70] sm:$0xff] %vm791_vm2, %v965_v62 }

</bundles_post_ra>
